<compile_context>
chip_gen: v7x
topology: tpu7x:2x2x1
jax: 0.10.0
libtpu: 0.0.40
codegen_flags: <defaults>
</compile_context>

<pallas_src>
import jax
import jax.numpy as jnp
from jax.experimental import pallas as pl
from jax.experimental.pallas import tpu as pltpu


def _round_up(n, m):
    return ((n + m - 1) // m) * m


def _vmem_need(tb_, ch_, f, hp):
    """Rough VMEM footprint (bytes) of one pipelined grid step."""
    fp = _round_up(f, 128)                 # x tile is lane-padded to 128
    return (2 * tb_ * fp * 4               # streamed f32 x tile, double-buffered
            + 2 * 8 * tb_ * 4              # (1, TB) out block (sublane-padded), x2
            + 2 * f * hp * 2               # resident bf16 w1
            + 4 * 8 * hp * 4               # b1 / w2 rows (sublane-padded), x2
            + 6 * ch_ * hp * 4             # f32 h chunk + fc2/epilogue temporaries
            + 2 * ch_ * fp * 2)            # bf16 x chunk copy


def _make_kernel(tb, ch):
    """Kernel for one batch tile of TB rows, processed in row chunks of CH."""
    nc = tb // ch
    assert nc * ch == tb

    def kernel(x_ref, w1_ref, b1_ref, w2_ref, b2_ref, o_ref):
        # x_ref : (TB, F) f32  streamed / double-buffered per grid step
        # w1_ref: (F, Hp) bf16 resident across grid steps
        # b1_ref: (1, Hp) f32  resident
        # w2_ref: (1, Hp) f32  resident (torch fc2.weight kept as a row)
        # b2_ref: (1, 1)  f32  SMEM scalar
        # o_ref : (1, TB) f32  lane-dense output row for this tile
        w1 = w1_ref[...]
        b1 = b1_ref[...]
        w2 = w2_ref[...]
        b2 = b2_ref[0, 0]

        def do_chunk(r0, rows):
            # In-kernel f32 -> bf16 cast (free VPU op, hidden under MXU/DMA).
            xs = x_ref[pl.ds(r0, rows), :].astype(jnp.bfloat16)
            # fc1 on the MXU, f32 accumulation; padded hidden cols stay 0.
            h = jnp.dot(xs, w1, preferred_element_type=jnp.float32)
            h = jnp.maximum(h + b1, 0.0)
            # fc2 (N=1) on the MXU: contract (1,Hp)x(rows,Hp) over Hp -> (1, rows),
            # which comes out lane-dense (batch on lanes).
            row = jax.lax.dot_general(
                w2, h, (((1,), (1,)), ((), ())),
                preferred_element_type=jnp.float32)
            o_ref[:, pl.ds(r0, rows)] = jnp.tanh(row + b2)

        if nc == 1:
            do_chunk(0, tb)
        else:
            def body(c, carry):
                do_chunk(pl.multiple_of(c * ch, ch), ch)
                return carry
            jax.lax.fori_loop(0, nc, body, None)

    return kernel


def prepare_params(fc1_w, fc1_b, fc2_w, fc2_b):
    """torch-layout params (fc1.weight (H,F), fc1.bias (H,), fc2.weight (1,H),
    fc2.bias (1,)) -> kernel layout: transpose, zero-pad hidden dim to 128,
    bf16 matmul weight.  Done once, outside pallas_call."""
    H, F = fc1_w.shape
    Hp = _round_up(H, 128)
    w1 = jnp.zeros((F, Hp), jnp.float32).at[:, :H].set(fc1_w.T).astype(jnp.bfloat16)
    b1 = jnp.zeros((1, Hp), jnp.float32).at[:, :H].set(fc1_b.reshape(1, H))
    w2 = jnp.zeros((1, Hp), jnp.float32).at[:, :H].set(fc2_w.reshape(1, H))
    b2 = jnp.asarray(fc2_b, jnp.float32).reshape(1, 1)
    return w1, b1, w2, b2


def net_forward(x, w1, b1, w2, b2, *, tb=4096, row_chunk=256):
    """Pallas forward for Net.  x: (B, F) f32; params from prepare_params().
    Returns (B, 1) f32."""
    B, F = x.shape
    Fw, Hp = w1.shape
    assert F == Fw, (F, Fw)
    if x.dtype != jnp.float32:
        x = x.astype(jnp.float32)

    # VMEM budget from the actual device (v7x: 64 MiB physical vs 128 MiB on
    # v5e/v6e); leave headroom for compiler-internal scratch.
    try:
        vmem_cap = int(pltpu.get_tpu_info().vmem_capacity_bytes)
    except Exception:
        vmem_cap = 64 * 1024 * 1024
    budget = int(vmem_cap * 0.6)

    if B <= 512:
        # Single full block (block dims == array dims): no padding, one step.
        TB = B
        CH = B
    else:
        CH = max(128, _round_up(min(row_chunk, 512), 128))
        # Batch tile: multiple of CH, at most tb, and small enough that the
        # grid has >= 2 steps so both v7x TensorCores get work.
        TB = min(_round_up(tb, CH), _round_up(pl.cdiv(B, 2), CH))
        TB = max(TB, CH)
        while TB > CH and _vmem_need(TB, CH, F, Hp) > budget:
            TB -= CH
    G = pl.cdiv(B, TB)

    need = _vmem_need(TB, CH, F, Hp)
    vmem_limit = int(min(budget, max(2 * need, 16 * 1024 * 1024)))

    cost = pl.CostEstimate(
        flops=int(2 * B * F * Hp + 5 * B * Hp),
        transcendentals=int(B),
        bytes_accessed=int(B * F * 4 + B * 4 + F * Hp * 2 + 2 * Hp * 4 + 4),
    )

    out = pl.pallas_call(
        _make_kernel(TB, CH),
        out_shape=jax.ShapeDtypeStruct((1, G * TB), jnp.float32),
        grid=(G,),
        in_specs=[
            pl.BlockSpec((TB, F), lambda i: (i, 0)),             # x: streamed f32
            pl.BlockSpec((F, Hp), lambda i: (0, 0)),             # w1: resident
            pl.BlockSpec((1, Hp), lambda i: (0, 0)),             # b1: resident
            pl.BlockSpec((1, Hp), lambda i: (0, 0)),             # w2 row: resident
            pl.BlockSpec(memory_space=pltpu.MemorySpace.SMEM),   # b2 scalar
        ],
        out_specs=pl.BlockSpec((1, TB), lambda i: (0, i)),
        compiler_params=pltpu.CompilerParams(
            dimension_semantics=("parallel",),   # megacore-shard the batch axis
            vmem_limit_bytes=vmem_limit,
        ),
        cost_estimate=cost,
    )(x, w1, b1, w2, b2)

    # Lane-dense (1, G*TB) row -> (B, 1); rows beyond B (partial last tile) dropped.
    return out[0, :B][:, None]


if __name__ == "__main__":
    # Small shapes consistent with the module: rows of preprocessed
    # (one-hot + scaled numeric) features.
    # TODO(synk): the sklearn preprocessing (OneHotEncoder/StandardScaler) is
    # host-side feature engineering, not part of the nn.Module forward.
    batch = 8
    input_size = 32     # stand-in for X_train_preprocessed_dense.shape[1]
    hidden_size = 100   # as in the module

    key = jax.random.PRNGKey(0)
    kx, k1, k2, k3, k4 = jax.random.split(key, 5)

    # torch.nn.Linear default init: U(-1/sqrt(fan_in), 1/sqrt(fan_in)), torch layouts.
    bound1 = 1.0 / (input_size ** 0.5)
    bound2 = 1.0 / (hidden_size ** 0.5)
    fc1_w = jax.random.uniform(k1, (hidden_size, input_size), jnp.float32, -bound1, bound1)
    fc1_b = jax.random.uniform(k2, (hidden_size,), jnp.float32, -bound1, bound1)
    fc2_w = jax.random.uniform(k3, (1, hidden_size), jnp.float32, -bound2, bound2)
    fc2_b = jax.random.uniform(k4, (1,), jnp.float32, -bound2, bound2)

    params = prepare_params(fc1_w, fc1_b, fc2_w, fc2_b)

    def ref_fwd(xx):
        # Reference in plain f32 JAX (same math as the torch forward).
        return jnp.tanh(jnp.maximum(xx @ fc1_w.T + fc1_b, 0.0) @ fc2_w.T + fc2_b)

    # 1) Tiny batch (single full block).
    x = jax.random.normal(kx, (batch, input_size), jnp.float32)
    out = jax.block_until_ready(net_forward(x, *params))
    assert out.shape == (batch, 1)
    ref = ref_fwd(x)
    assert jnp.allclose(out, ref, atol=2e-2, rtol=2e-2), float(jnp.max(jnp.abs(out - ref)))

    # 2) Ragged small batch (B not a multiple of 8, still a single full block).
    x2 = jax.random.normal(jax.random.fold_in(kx, 1), (50, input_size), jnp.float32)
    out2 = jax.block_until_ready(net_forward(x2, *params))
    ref2 = ref_fwd(x2)
    assert out2.shape == (50, 1)
    assert jnp.allclose(out2, ref2, atol=2e-2, rtol=2e-2), float(jnp.max(jnp.abs(out2 - ref2)))

    # 3) Larger batch: multi-step grid (megacore split), in-kernel row-chunk
    #    loop, partial trailing x tile with no wrapper padding.
    x3 = jax.random.normal(jax.random.fold_in(kx, 2), (1300, input_size), jnp.float32)
    out3 = jax.block_until_ready(net_forward(x3, *params))
    ref3 = ref_fwd(x3)
    assert out3.shape == (1300, 1)
    assert jnp.allclose(out3, ref3, atol=2e-2, rtol=2e-2), float(jnp.max(jnp.abs(out3 - ref3)))

    print("KERNEL_OK")
</pallas_src>

<mosaic_0001>
module attributes {stable_mosaic.version = 11 : i64} {
  func.func @kernel(%arg0: i32, %arg1: memref<8x32xf32, #tpu.memory_space<vmem>>, %arg2: memref<32x128xbf16, #tpu.memory_space<vmem>>, %arg3: memref<1x128xf32, #tpu.memory_space<vmem>>, %arg4: memref<1x128xf32, #tpu.memory_space<vmem>>, %arg5: memref<1x1xf32, #tpu.memory_space<smem>>, %arg6: memref<1x8xf32, #tpu.memory_space<vmem>>) attributes {dimension_semantics = [#tpu.dimension_semantics<parallel>], iteration_bounds = array<i64: 1>, scalar_prefetch = 0 : i64, scratch_operands = 0 : i64, tpu.core_type = #tpu.core_type<tc>, window_params = [{transform_indices = @transform_0, window_bounds = array<i64: 8, 32>}, {pipeline_mode = #tpu.pipeline_mode<synchronous>, transform_indices = @transform_1, window_bounds = array<i64: 32, 128>}, {pipeline_mode = #tpu.pipeline_mode<synchronous>, transform_indices = @transform_2, window_bounds = array<i64: 1, 128>}, {pipeline_mode = #tpu.pipeline_mode<synchronous>, transform_indices = @transform_3, window_bounds = array<i64: 1, 128>}, {transform_indices = @transform_4, window_bounds = array<i64: 1, 1>}, {transform_indices = @transform_5, window_bounds = array<i64: 1, 8>}]} {
    %c0 = arith.constant 0 : index
    %c0_0 = arith.constant 0 : index
    %0 = vector.load %arg2[%c0, %c0_0] : memref<32x128xbf16, #tpu.memory_space<vmem>>, vector<32x128xbf16>
    %c0_1 = arith.constant 0 : index
    %c0_2 = arith.constant 0 : index
    %1 = vector.load %arg3[%c0_1, %c0_2] : memref<1x128xf32, #tpu.memory_space<vmem>>, vector<1x128xf32>
    %c0_3 = arith.constant 0 : index
    %c0_4 = arith.constant 0 : index
    %2 = vector.load %arg4[%c0_3, %c0_4] : memref<1x128xf32, #tpu.memory_space<vmem>>, vector<1x128xf32>
    %c0_5 = arith.constant 0 : index
    %c0_6 = arith.constant 0 : index
    %3 = memref.load %arg5[%c0_5, %c0_6] : memref<1x1xf32, #tpu.memory_space<smem>>
    %c0_7 = arith.constant 0 : index
    %c0_8 = arith.constant 0 : index
    %4 = vector.load %arg1[%c0_7, %c0_8] : memref<8x32xf32, #tpu.memory_space<vmem>>, vector<8x32xf32>
    %5 = arith.truncf %4 : vector<8x32xf32> to vector<8x32xbf16>
    %cst = arith.constant dense<0.000000e+00> : vector<8x128xf32>
    %6 = tpu.matmul %5, %0, %cst {dimension_numbers = #tpu.dot_dimension_numbers<[1], [0], [0], [1], [0, 0, 1, 1], [], []>} : vector<8x32xbf16>, vector<32x128xbf16>, vector<8x128xf32> -> vector<8x128xf32>
    %7 = vector.broadcast %1 : vector<1x128xf32> to vector<8x128xf32>
    %8 = arith.addf %6, %7 : vector<8x128xf32>
    %cst_9 = arith.constant 0.000000e+00 : f32
    %9 = vector.broadcast %cst_9 : f32 to vector<8x128xf32>
    %10 = arith.maximumf %8, %9 : vector<8x128xf32>
    %cst_10 = arith.constant dense<0.000000e+00> : vector<1x8xf32>
    %11 = tpu.matmul %2, %10, %cst_10 {dimension_numbers = #tpu.dot_dimension_numbers<[1], [1], [0], [0], [0, 0, 1, 0], [], []>} : vector<1x128xf32>, vector<8x128xf32>, vector<1x8xf32> -> vector<1x8xf32>
    %12 = vector.broadcast %3 : f32 to vector<1x8xf32>
    %13 = arith.addf %11, %12 : vector<1x8xf32>
    %14 = math.tanh %13 : vector<1x8xf32>
    %c0_11 = arith.constant 0 : index
    %c0_12 = arith.constant 0 : index
    %15 = vector.load %arg6[%c0_11, %c0_12] : memref<1x8xf32, #tpu.memory_space<vmem>>, vector<1x8xf32>
    tpu.vector_store %arg6[%c0_11, %c0_12], %14 {strides = array<i32>} : memref<1x8xf32, #tpu.memory_space<vmem>>, vector<1x8xf32>,
    return
  }
  func.func @transform_0(%arg0: i32) -> (i32, i32) {
    %c0_i32 = arith.constant 0 : i32
    %c0_i32_0 = arith.constant 0 : i32
    return %arg0, %c0_i32 : i32, i32
  }
  func.func @transform_1(%arg0: i32) -> (i32, i32) {
    %c0_i32 = arith.constant 0 : i32
    %c0_i32_0 = arith.constant 0 : i32
    %c0_i32_1 = arith.constant 0 : i32
    return %c0_i32, %c0_i32_0 : i32, i32
  }
  func.func @transform_2(%arg0: i32) -> (i32, i32) {
    %c0_i32 = arith.constant 0 : i32
    %c0_i32_0 = arith.constant 0 : i32
    %c0_i32_1 = arith.constant 0 : i32
    return %c0_i32, %c0_i32_0 : i32, i32
  }
  func.func @transform_3(%arg0: i32) -> (i32, i32) {
    %c0_i32 = arith.constant 0 : i32
    %c0_i32_0 = arith.constant 0 : i32
    %c0_i32_1 = arith.constant 0 : i32
    return %c0_i32, %c0_i32_0 : i32, i32
  }
  func.func @transform_4(%arg0: i32) -> (i32, i32) {
    %c0_i32 = arith.constant 0 : i32
    %c0_i32_0 = arith.constant 0 : i32
    %c0_i32_1 = arith.constant 0 : i32
    return %c0_i32, %c0_i32_0 : i32, i32
  }
  func.func @transform_5(%arg0: i32) -> (i32, i32) {
    %c0_i32 = arith.constant 0 : i32
    %c0_i32_0 = arith.constant 0 : i32
    return %c0_i32, %arg0 : i32, i32
  }
}

</mosaic_0001>

<bundles_post_ra>
// kernel: tpu_custom_call.1
= control target key start
LH: loop header
LB: loop body
LE: loop exit
PB: predicated region body
PF: predicated region fallthrough
CT: control target
= control target key end

     0   :  { %11 = vsyncpa [#allocation4], 0  ;;  %s405_s0 = inlined_call_operand.hbm [shape: f32[8,32], index: 0, kind: input, shape index: {}]   ;;  %s406_s1 = inlined_call_operand.hbm [shape: bf16[32,128], index: 1, kind: input, shape index: {}]   ;;  %s407_s2 = inlined_call_operand.vmem [shape: f32[1,128], index: 2, kind: input, shape index: {}]   ;;  %s408_s3 = inlined_call_operand.vmem [shape: f32[1,128], index: 3, kind: input, shape index: {}]   ;;  %s409_s4 = inlined_call_operand.<no memory space> [shape: f32[1,1], index: 4, kind: input, shape index: {}]   ;;  %s410_s5 = inlined_call_operand.hbm [shape: f32[1,8], index: 5, kind: output, shape index: {}]  }
   0x1   :  { %12 = vsyncpa [#allocation7], 0 }
   0x2   :  { %13 = vsyncpa [#allocation5], 0  ;;  %s316_s18 = smov [#allocation3]   ;;  %s317_s20 = smov [#allocation6]  }
   0x3   :  { %s20_s19 = sshll.u32 %s316_s18, 4  ;;  %s29_s21 = sshll.u32 %s317_s20, 4  ;;  %s21_s19 = int_to_ptr.vmem [resolvable:$true] %s20_s19  ;;  %s353_s21 = int_to_ptr.vmem [resolvable:$true] %s29_s21 }
   0x4   :  { %s244_s24 = scalar_lea.hbm %s405_s0, 128 }
   0x5   :  { %p245_p0 = scmp.ne.s32.totalorder %s405_s0, %s244_s24  ;;  %p248_p1 = scmp.lt.u32.totalorder %s244_s24, %s405_s0 }
   0x7   :  { %p250_p2 = pnand %p248_p1, %p245_p0 }
   0x9   :  { %253 = shalt.err (!%p250_p2)
}
   0xa   :  { %s254_s29 = scalar_lea.vmem %s21_s19, 128  ;;  %p259_p4 = scmp.lt.s32.totalorder %s21_s19, %s21_s19 }
   0xb   :  { %p255_p3 = scmp.ne.s32.totalorder %s21_s19, %s254_s29  ;;  %p260_p5 = scmp.lt.s32.totalorder %s254_s29, %s254_s29 }
   0xd   :  { %p261_p6 = por %p260_p5, %p259_p4 }
   0xf   :  { %p262_p7 = pnand %p261_p6, %p255_p3 }
  0x11   :  { %265 = shalt.err (!%p262_p7)
}
  0x12   :  { %23 = dma.hbm_to_vmem [thread:$0]  %s405_s0, 128, %s21_s19, [#allocation4]  }
  0x13   :  { %s266_s9 = scalar_lea.hbm %s406_s1, 256 }
  0x14   :  { %p267_p8 = scmp.ne.s32.totalorder %s406_s1, %s266_s9  ;;  %p270_p9 = scmp.lt.u32.totalorder %s266_s9, %s406_s1 }
  0x16   :  { %p272_p10 = pnand %p270_p9, %p267_p8 }
  0x18   :  { %275 = shalt.err (!%p272_p10)
}
  0x19   :  { %s276_s14 = scalar_lea.vmem %s353_s21, 256  ;;  %p281_p12 = scmp.lt.s32.totalorder %s353_s21, %s353_s21 }
  0x1a   :  { %p277_p11 = scmp.ne.s32.totalorder %s353_s21, %s276_s14  ;;  %p282_p13 = scmp.lt.s32.totalorder %s276_s14, %s276_s14 }
  0x1c   :  { %p283_p0 = por %p282_p13, %p281_p12 }
  0x1e   :  { %p284_p1 = pnand %p283_p0, %p277_p11 }
  0x20   :  { %287 = shalt.err (!%p284_p1)
}
  0x21   :  { %s318_s0 = smov 64   ;;  %s319_s15 = smov 4  }
  0x22   :  { %35 = dma.hbm_to_vmem [thread:$0]  %s406_s1, 256, %s353_s21, [#allocation7], %s318_s0, %s318_s0, %s319_s15  }
  0x23   :  { %310 = dma.done.wait [#allocation4], 128  }
  0x24   :  { %311 = vsyncadd [#allocation4], 4294967168 }
  0x25   :  { %312 = dma.done.wait [#allocation7], 256  }
  0x26   :  { %313 = vsyncadd [#allocation7], 4294967040  ;;  %v320_v0 = vmov 0.0   ;;  %vm321_vm0 = vmmov 0   ;;  %v240_v1 = vld [vmem:[#allocation6] sm:$0xff]   ;;  %v241_v2 = vld [vmem:[#allocation6 + $0x8] sm:$0xff]   ;;  %v121_v13 = vstv %s409_s4 }
  0x27   :  { %220 = vmatprep.subr.bf16.mxu0 %v320_v0  ;;  %224 = vmatprep.mubr.msk.bf16.mxu0 %vm321_vm0, %v320_v0  ;;  %v56_v3 = vld [vmem:[#allocation3] sm:$0xff]  ;;  %vm76_vm1 = vcmask 261120   ;;  %vm193_vm2 = vcmask 57344  }
  0x28   :  { %228 = vmatprep.subr.mxu1 %v320_v0  ;;  %230 = vmatprep.mubr.msk.f32.mxu1 %vm321_vm0, %v320_v0  ;;  %v57_v4 = vpack.c.bf16 %v56_v3, %v56_v3  ;;  %v211_v5 = vld [vmem:[%s407_s2] ss:$0 sm:$0xff]  ;;  %s322_s2 = smov [#allocation8]  }
  0x29   :  { %221 = vmatpush3.bf16.msra.mxu0 %v240_v1  ;;  %v54_v12 = vld [vmem:[%s408_s3] sm:$0x1]  ;;  %s201_s23 = sshll.u32 %s322_s2, 4  ;;  %s202_s23 = int_to_ptr.vmem [resolvable:$true] %s201_s23 }
  0x2a   :  { %222 = vmatprep.subr.bf16.mxu0 %v320_v0  ;;  %s288_s24 = scalar_lea.vmem %s202_s23, 16  ;;  %s292_s25 = scalar_lea.vmem %s202_s23, 32 }
  0x2b   :  { %p289_p2 = scmp.ne.s32.totalorder %s202_s23, %s288_s24  ;;  %p293_p3 = scmp.lt.s32.totalorder %s202_s23, %s202_s23 }
  0x2c   :  { %p294_p4 = scmp.lt.s32.totalorder %s292_s25, %s288_s24 }
  0x2d   :  { %223 = vmatpush3.bf16.msra.mxu0 %v241_v2 }
  0x2e   :  { %p295_p5 = por %p294_p4, %p293_p3 }
  0x30   :  { %225 = vmatmul.mubr.msk.bf16.vlgmr.msra.gmra.mrb[0].mxu0 %vm76_vm1, %v57_v4  ;;  %p296_p6 = pnand %p295_p5, %p289_p2 }
 0x103   :  { %v114_v6 = vpop.f32.mrb[0].mxu0 }
 0x104   :  { %v115_v7 = vadd.f32 %v211_v5, %v114_v6  ;;  %v226_v8 = vpop.f32.mrb[1].mxu0 }
 0x105   :  { %v117_v9 = vpop.f32.mrb[2].mxu0 }
 0x106   :  { %v120_v10 = vmax.f32 %v115_v7, 0.0  ;;  %v227_v11 = vpop.f32.mrb[3].mxu0 }
 0x108   :  { %229 = vmatpush3.xpose.msra.mxu1 %v120_v10 }
 0x10b   :  { %231 = vmatmul.mubr.f32.vlgmr.msra.gmra.mrb[0].mxu1 %v54_v12 }
 0x1de   :  { %v188_v14 = vpop.f32.mrb[0].mxu1 }
 0x1df   :  { %v189_v15 = vadd.f32 %v188_v14, %v121_v13  ;;  %v232_v16 = vpop.f32.mrb[1].mxu1 }
 0x1e1   :  { %242 = vtanh.f32 %v189_v15 }
 0x1eb   :  { %v243_v17 = vpop.eup %242 }
 0x1ec   :  { %194 = vst.msk [vmem:[#allocation8] sm:$0x1] %vm193_vm2, %v243_v17 }
 0x1ed   :  { %299 = shalt.err (!%p296_p6)
}
 0x1ee   :  { %s300_s26 = scalar_lea.hbm %s410_s5, 16 }
 0x1ef   :  { %p301_p7 = scmp.ne.s32.totalorder %s410_s5, %s300_s26  ;;  %p304_p8 = scmp.lt.u32.totalorder %s300_s26, %s410_s5 }
 0x1f1   :  { %p306_p9 = pnand %p304_p8, %p301_p7 }
 0x1f3   :  { %309 = shalt.err (!%p306_p9)
}
 0x1f4   :  { %204 = dma.vmem_to_hbm [thread:$0]  %s202_s23, 16, %s410_s5, [#allocation5]  }
 0x1f5   :  { %314 = dma.done.wait [#allocation5], 16  }
 0x1f6   :  { %315 = vsyncadd [#allocation5], 4294967280 }
 0x1f7   :  { %208 = vsyncpa [#allocation4], 1 }
 0x1f8   :  { %209 = vsyncpa [#allocation7], 1 }
 0x1f9   :  { %210 = vsyncpa [#allocation5], 1 }

</bundles_post_ra>
